<compile_context>
chip_gen: v6e
topology: v6e:2x2x1
jax: 0.10.0
libtpu: 0.0.40
codegen_flags: <defaults>
</compile_context>

<pallas_src>
import jax
import jax.numpy as jnp
from jax.experimental import pallas as pl
from jax.experimental.pallas import tpu as pltpu


def upsampling_kernel(x_ref, e_ref, b_ref, o_ref):
    # x_ref: (rb, tb)      VMEM input block
    # e_ref: (tb, tb*U)    VMEM resident expansion matrix (constant index_map)
    # b_ref: (1,)          SMEM scalar bias
    # o_ref: (rb, tb*U)    VMEM lane-dense output block
    y = jnp.dot(x_ref[...], e_ref[...], preferred_element_type=jnp.float32)
    o_ref[...] = (y + b_ref[0]).astype(o_ref.dtype)


def _tile_budget_bytes():
    """Per-generation output-tile budget.

    v7x (64 MiB VMEM / TC): ~2 MiB tiles -- already near the 3.2 TB/s HBM
    roofline with 1024-lane tiles.  v5e/v6e (128 MiB VMEM): ~4 MiB tiles to
    amortize per-grid-step overhead.
    """
    try:
        vmem = getattr(pltpu.get_tpu_info(), "vmem_capacity_bytes", 0)
    except Exception:
        vmem = 0
    if vmem and vmem > (64 << 20):
        return 4 << 20
    return 2 << 20


def _choose_blocks(n_rows, t, u, itemsize, tile_budget):
    """Pick (row_block, t_block).  tb capped at 128 (MXU MACs per output elem
    == tb); rb from the output-tile budget, multiple of 8.  Divisibility is
    handled by wrapper-side padding, never by blowing up the block size."""
    tb = t if t < 128 else 128
    r_pad8 = -(-n_rows // 8) * 8
    rb_budget = max(8, (tile_budget // (tb * u * itemsize)) // 8 * 8)
    rb = min(rb_budget, r_pad8)
    # Keep >= 2 grid steps when the shape allows it so both v7x TensorCores
    # get work (harmless on single-TC v5e/v6e).
    grid_t = -(-t // tb)
    if grid_t == 1 and rb >= r_pad8 and r_pad8 >= 16:
        rb = max(8, ((r_pad8 // 2 + 7) // 8) * 8)
    return rb, tb


def upsampling_forward(x, w_taps, b, upsampling_factor):
    """x: (B, C, T) -> (B, C, T * upsampling_factor).

    w_taps: (U,) deconv taps; b: (1,) bias (ConvTranspose2d(1,1,(1,U),(1,U)))."""
    B, C, T = x.shape
    U = int(upsampling_factor)
    R = B * C
    itemsize = x.dtype.itemsize

    x2 = x.reshape(R, T)  # merges leading dims only: free, no relayout

    rb, tb = _choose_blocks(R, T, U, itemsize, _tile_budget_bytes())

    # Pad to block multiples (only when needed); sliced back off below.
    R_pad = pl.cdiv(R, rb) * rb
    T_pad = pl.cdiv(T, tb) * tb
    if (R_pad, T_pad) != (R, T):
        x2 = jnp.pad(x2, ((0, R_pad - R), (0, T_pad - T)))

    # Block-diagonal expansion matrix with the taps folded in:
    #   E[t, t*U + u] = w[u]   (identical for every T block -> resident in VMEM)
    eye = jnp.eye(tb, dtype=x.dtype)
    e_mat = (eye[:, :, None] * w_taps.astype(x.dtype)[None, None, :]).reshape(
        tb, tb * U)

    # Double-buffered working set: 2 in-tiles + 2 out-tiles + 1 resident E.
    ws_bytes = (2 * rb * tb + 2 * rb * tb * U + tb * tb * U) * itemsize
    vmem_limit = max(32 << 20, 2 * ws_bytes)

    out2 = pl.pallas_call(
        upsampling_kernel,
        out_shape=jax.ShapeDtypeStruct((R_pad, T_pad * U), x.dtype),
        grid_spec=pl.GridSpec(
            grid=(R_pad // rb, T_pad // tb),
            in_specs=[
                pl.BlockSpec((rb, tb), lambda i, j: (i, j)),
                pl.BlockSpec((tb, tb * U), lambda i, j: (0, 0),
                             pipeline_mode=pl.Buffered(1)),
                pl.BlockSpec(memory_space=pltpu.MemorySpace.SMEM),
            ],
            out_specs=pl.BlockSpec((rb, tb * U), lambda i, j: (i, j)),
        ),
        compiler_params=pltpu.CompilerParams(
            dimension_semantics=("parallel", "parallel"),
            vmem_limit_bytes=vmem_limit),
    )(x2, e_mat, b)

    if (R_pad, T_pad) != (R, T):
        out2 = out2[:R, :T * U]
    return out2.reshape(B, C, T * U)  # splits leading dim only: free


if __name__ == "__main__":
    # Module config / small shapes
    upsampling_factor = 8
    B, C, T = 2, 4, 16

    key = jax.random.PRNGKey(0)
    kx, kw, kb = jax.random.split(key, 3)

    x = jax.random.normal(kx, (B, C, T), dtype=jnp.float32)

    # ConvTranspose2d(1, 1, (1, U), stride=(1, U)): weight (1, 1, 1, U), bias (1,)
    # Deterministic synthetic init (PyTorch-style uniform bound 1/sqrt(U)).
    bound = 1.0 / jnp.sqrt(jnp.float32(upsampling_factor))
    w_full = jax.random.uniform(kw, (1, 1, 1, upsampling_factor),
                                dtype=jnp.float32, minval=-bound, maxval=bound)
    b_full = jax.random.uniform(kb, (1,), dtype=jnp.float32,
                                minval=-bound, maxval=bound)

    w_taps = w_full.reshape(upsampling_factor)  # (U,)

    out = upsampling_forward(x, w_taps, b_full, upsampling_factor)
    out = jax.block_until_ready(out)

    # Pure-JAX f32 reference of the same ConvTranspose(kernel==stride) semantics.
    ref = (x[..., None] * w_taps[None, None, None, :] + b_full[0]).reshape(
        B, C, T * upsampling_factor)

    assert out.shape == (B, C, T * upsampling_factor), out.shape
    # Default (single bf16 MXU pass) precision: tolerance covers one bf16
    # rounding of x and w per element.
    assert jnp.allclose(out, ref, atol=2e-2, rtol=2e-2), float(
        jnp.max(jnp.abs(out - ref)))
    print("KERNEL_OK")
</pallas_src>

<mosaic_0001>
module attributes {stable_mosaic.version = 11 : i64} {
  func.func @upsampling_kernel(%arg0: i32, %arg1: i32, %arg2: memref<8x16xf32, #tpu.memory_space<vmem>>, %arg3: memref<16x128xf32, #tpu.memory_space<vmem>>, %arg4: memref<1xf32, #tpu.memory_space<smem>>, %arg5: memref<8x128xf32, #tpu.memory_space<vmem>>) attributes {dimension_semantics = [#tpu.dimension_semantics<parallel>, #tpu.dimension_semantics<parallel>], iteration_bounds = array<i64: 1, 1>, scalar_prefetch = 0 : i64, scratch_operands = 0 : i64, tpu.core_type = #tpu.core_type<tc>, window_params = [{transform_indices = @transform_0, window_bounds = array<i64: 8, 16>}, {pipeline_mode = #tpu.pipeline_mode<synchronous>, transform_indices = @transform_1, window_bounds = array<i64: 16, 128>}, {transform_indices = @transform_2, window_bounds = array<i64: 1>}, {transform_indices = @transform_3, window_bounds = array<i64: 8, 128>}]} {
    %c0 = arith.constant 0 : index
    %c0_0 = arith.constant 0 : index
    %0 = vector.load %arg2[%c0, %c0_0] : memref<8x16xf32, #tpu.memory_space<vmem>>, vector<8x16xf32>
    %c0_1 = arith.constant 0 : index
    %c0_2 = arith.constant 0 : index
    %1 = vector.load %arg3[%c0_1, %c0_2] : memref<16x128xf32, #tpu.memory_space<vmem>>, vector<16x128xf32>
    %cst = arith.constant dense<0.000000e+00> : vector<8x128xf32>
    %2 = tpu.matmul %0, %1, %cst {dimension_numbers = #tpu.dot_dimension_numbers<[1], [0], [0], [1], [0, 0, 1, 1], [], []>} : vector<8x16xf32>, vector<16x128xf32>, vector<8x128xf32> -> vector<8x128xf32>
    %c0_3 = arith.constant 0 : index
    %3 = memref.load %arg4[%c0_3] : memref<1xf32, #tpu.memory_space<smem>>
    %4 = vector.broadcast %3 : f32 to vector<8x128xf32>
    %5 = arith.addf %2, %4 : vector<8x128xf32>
    %c0_4 = arith.constant 0 : index
    %c0_5 = arith.constant 0 : index
    %6 = vector.load %arg5[%c0_4, %c0_5] : memref<8x128xf32, #tpu.memory_space<vmem>>, vector<8x128xf32>
    tpu.vector_store %arg5[%c0_4, %c0_5], %5 {strides = array<i32>} : memref<8x128xf32, #tpu.memory_space<vmem>>, vector<8x128xf32>,
    return
  }
  func.func @transform_0(%arg0: i32, %arg1: i32) -> (i32, i32) {
    %c0_i32 = arith.constant 0 : i32
    return %arg0, %arg1 : i32, i32
  }
  func.func @transform_1(%arg0: i32, %arg1: i32) -> (i32, i32) {
    %c0_i32 = arith.constant 0 : i32
    %c0_i32_0 = arith.constant 0 : i32
    %c0_i32_1 = arith.constant 0 : i32
    return %c0_i32, %c0_i32_0 : i32, i32
  }
  func.func @transform_2(%arg0: i32, %arg1: i32) -> i32 {
    %c0_i32 = arith.constant 0 : i32
    %c0_i32_0 = arith.constant 0 : i32
    return %c0_i32 : i32
  }
  func.func @transform_3(%arg0: i32, %arg1: i32) -> (i32, i32) {
    %c0_i32 = arith.constant 0 : i32
    return %arg0, %arg1 : i32, i32
  }
}

</mosaic_0001>

<bundles_post_ra>
// kernel: tpu_custom_call.1
= control target key start
LH: loop header
LB: loop body
LE: loop exit
PB: predicated region body
PF: predicated region fallthrough
CT: control target
= control target key end

     0   :  { %9 = vsyncpa [#allocation4], 0  ;;  %s261_s0 = inlined_call_operand.hbm [shape: f32[8,16], index: 0, kind: input, shape index: {}]   ;;  %s262_s1 = inlined_call_operand.hbm [shape: f32[16,128], index: 1, kind: input, shape index: {}]   ;;  %s263_s2 = inlined_call_operand.<no memory space> [shape: f32[1], index: 2, kind: input, shape index: {}]   ;;  %s264_s3 = inlined_call_operand.hbm [shape: f32[8,128], index: 3, kind: output, shape index: {}]  }
   0x1   :  { %10 = vsyncpa [#allocation7], 0 }
   0x2   :  { %11 = vsyncpa [#allocation5], 0  ;;  %s222_s12 = smov [#allocation3]   ;;  %s223_s14 = smov [#allocation6]  }
   0x3   :  { %s18_s13 = sshll.u32 %s222_s12, 4  ;;  %s27_s15 = sshll.u32 %s223_s14, 4  ;;  %s19_s13 = int_to_ptr.vmem [resolvable:$true] %s18_s13  ;;  %s28_s15 = int_to_ptr.vmem [resolvable:$true] %s27_s15 }
   0x4   :  { %s164_s16 = scalar_lea.vmem %s19_s13, 128  ;;  %p169_p1 = scmp.lt.s32.totalorder %s19_s13, %s19_s13 }
   0x5   :  { %p165_p0 = scmp.ne.s32.totalorder %s19_s13, %s164_s16  ;;  %p170_p2 = scmp.lt.s32.totalorder %s164_s16, %s164_s16 }
   0x7   :  { %p171_p3 = por %p170_p2, %p169_p1 }
   0x9   :  { %p172_p4 = pnand %p171_p3, %p165_p0 }
   0xb   :  { %175 = shalt.err (!%p172_p4)
}
   0xc   :  { %21 = dma.hbm_to_vmem [thread:$0]  %s261_s0, 128, %s19_s13, [#allocation4]  }
   0xd   :  { %s184_s19 = scalar_lea.vmem %s28_s15, 256  ;;  %p189_p6 = scmp.lt.s32.totalorder %s28_s15, %s28_s15 }
   0xe   :  { %p185_p5 = scmp.ne.s32.totalorder %s28_s15, %s184_s19  ;;  %p190_p7 = scmp.lt.s32.totalorder %s184_s19, %s184_s19 }
  0x10   :  { %p191_p8 = por %p190_p7, %p189_p6 }
  0x12   :  { %p192_p9 = pnand %p191_p8, %p185_p5 }
  0x14   :  { %195 = shalt.err (!%p192_p9)
}
  0x15   :  { %s224_s20 = smov 128   ;;  %s225_s21 = smov 8  }
  0x16   :  { %33 = dma.hbm_to_vmem [thread:$0]  %s262_s1, 256, %s28_s15, [#allocation7], %s224_s20, %s224_s20, %s225_s21  }
  0x17   :  { %216 = dma.done.wait [#allocation4], 128  }
  0x18   :  { %217 = vsyncadd [#allocation4], 4294967168 }
  0x19   :  { %218 = dma.done.wait [#allocation7], 256  }
  0x1a   :  { %219 = vsyncadd [#allocation7], 4294967040  ;;  %v226_v0 = vmov 0.0   ;;  %vm227_vm0 = vmmov 0   ;;  %v44_v1 = vld [vmem:[#allocation6 + $0x8] sm:$0xff]  ;;  %v43_v2 = vld [vmem:[#allocation6] sm:$0xff]  ;;  %v46_v4 = vstv %s263_s2 }
  0x1b   :  { %142 = vmatprep.subr.mxu0 %v226_v0  ;;  %146 = vmatprep.mubr.msk.f32.mxu0 %vm227_vm0, %v226_v0  ;;  %v42_v3 = vld [vmem:[#allocation3] sm:$0xff]  ;;  %vm47_vm1 = vcmask 130048   ;;  %s228_s1 = smov [#allocation8]  }
  0x1c   :  { %143 = vmatpush3.msra.mxu0 %v44_v1  ;;  %s128_s25 = sshll.u32 %s228_s1, 4  ;;  %s129_s25 = int_to_ptr.vmem [resolvable:$true] %s128_s25 }
  0x1d   :  { %144 = vmatprep.subr.mxu0 %v226_v0  ;;  %s196_s26 = scalar_lea.vmem %s129_s25, 128  ;;  %p201_p11 = scmp.lt.s32.totalorder %s129_s25, %s129_s25 }
  0x1e   :  { %145 = vmatpush3.msra.mxu0 %v43_v2  ;;  %p197_p10 = scmp.ne.s32.totalorder %s129_s25, %s196_s26  ;;  %p202_p12 = scmp.lt.s32.totalorder %s196_s26, %s196_s26 }
  0x1f   :  { %147 = vmatmul.mubr.msk.f32.vlgmr.msra.gmra.mxu0 %vm47_vm1, %v42_v3 }
  0x20   :  { %p203_p13 = por %p202_p12, %p201_p11 }
  0x22   :  { %p204_p0 = pnand %p203_p13, %p197_p10 }
  0xdf   :  { %v117_v5 = vpop.f32.mrf.mxu0 }
  0xe0   :  { %v118_v6 = vadd.f32 %v117_v5, %v46_v4 }
  0xe1   :  { %v148_v7 = vpop.f32.mrf.mxu0 }
  0xe2   :  { %121 = vst [vmem:[#allocation8] sm:$0xff] %v118_v6 }
  0xe3   :  { %207 = shalt.err (!%p204_p0)
}
  0xe4   :  { %131 = dma.vmem_to_hbm [thread:$0]  %s129_s25, 128, %s264_s3, [#allocation5]  }
  0xe5   :  { %220 = dma.done.wait [#allocation5], 128  }
  0xe6   :  { %221 = vsyncadd [#allocation5], 4294967168 }
  0xe7   :  { %135 = vsyncpa [#allocation4], 1 }
  0xe8   :  { %136 = vsyncpa [#allocation7], 1 }
  0xe9   :  { %137 = vsyncpa [#allocation5], 1 }

</bundles_post_ra>
